<compile_context>
chip_gen: v6e
topology: v6e:2x2x1
jax: 0.10.0
libtpu: 0.0.40
codegen_flags: <defaults>
</compile_context>

<pallas_src>
import functools

import numpy as np

import jax
import jax.numpy as jnp
from jax import lax
from jax.experimental import pallas as pl
from jax.experimental.pallas import tpu as pltpu


def _round_up(x, m):
    return ((x + m - 1) // m) * m


# ----------------------------------------------------------------------------
# Pallas kernel. grid = (head, batch, m_tile, n_tile); n_tile is the reduction.
# ----------------------------------------------------------------------------
def _relation_attention_kernel(nvalid_ref,                       # SMEM (B,) int32
                               first_ref,                        # (tile_n, dk_pad)
                               second_ref,                       # (tile_m, dq_pad)
                               kw_ref, qw_ref, vw_ref,           # per-head weights
                               out_ref,                          # (tile_m, dvp)
                               q_scr, den_scr, acc_scr,          # VMEM scratch
                               *, tile_n, inv_md, approx_recip):
    b = pl.program_id(1)
    n = pl.program_id(3)
    cd = kw_ref.dtype                                            # MXU input dtype

    @pl.when(n == 0)
    def _init():
        # Q projection for this (head, batch, m-tile); bias comes from the ones
        # column folded into qw.  Fold the L2 norm and 1/app_mdim into Q once
        # here instead of scaling the (tile_m, tile_n) logits every N step.
        q = jnp.dot(second_ref[...], qw_ref[...],
                    preferred_element_type=jnp.float32)          # (tile_m, mdp)
        ssq = jnp.sum(q * q, axis=-1, keepdims=True)
        q_scr[...] = (q * (lax.rsqrt(ssq) * inv_md)).astype(q_scr.dtype)
        den_scr[...] = jnp.zeros_like(den_scr)
        acc_scr[...] = jnp.zeros_like(acc_scr)

    # K/V projection of the current key tile (f32 accumulation on the MXU).
    f_tile = first_ref[...]                                      # (tile_n, dk_pad)
    k_tile = jnp.dot(f_tile, kw_ref[...],
                     preferred_element_type=jnp.float32).astype(cd)   # (tile_n, mdp)
    v_tile = jnp.dot(f_tile, vw_ref[...],
                     preferred_element_type=jnp.float32).astype(cd)   # (tile_n, dvp)

    # logits = Q_hat @ K^T without an explicit transpose: contract the last axes.
    logits = lax.dot_general(q_scr[...], k_tile,
                             dimension_numbers=(((1,), (1,)), ((), ())),
                             preferred_element_type=jnp.float32)  # (tile_m, tile_n)

    # Faithful to the torch code: exp with no running-max subtraction.
    p = jnp.exp(logits)
    key_idx = n * tile_n + lax.broadcasted_iota(jnp.int32, p.shape, 1)
    p = jnp.where(key_idx < nvalid_ref[b], p, 0.0)               # mask padded keys

    den_scr[...] += jnp.sum(p, axis=-1, keepdims=True)
    acc_scr[...] += jnp.dot(p.astype(cd), v_tile,
                            preferred_element_type=jnp.float32)

    @pl.when(n == pl.num_programs(3) - 1)
    def _finalize():
        out_ref[...] = (acc_scr[...] *
                        pl.reciprocal(den_scr[...], approx=approx_recip)
                        ).astype(out_ref.dtype)


@functools.partial(
    jax.jit,
    static_argnames=("head_count", "md", "mdp", "dvp",
                     "tile_n", "tile_m", "approx_recip"))
def _batched_relation_attention(nvalid, first, second, kw, qw, vw, *,
                                head_count, md, mdp, dvp,
                                tile_n, tile_m, approx_recip):
    """first: (B, Np, dk_pad); second: (B, Mp, dq_pad); weights head-blocked and
    lane-padded with the bias folded in as an extra input row.
    Returns (B, head_count, Mp, dvp) float32."""
    B, Np, dk_pad = first.shape
    _, Mp, dq_pad = second.shape
    grid = (head_count, B, Mp // tile_m, Np // tile_n)

    kernel = functools.partial(_relation_attention_kernel,
                               tile_n=tile_n, inv_md=1.0 / float(md),
                               approx_recip=approx_recip)

    return pl.pallas_call(
        kernel,
        out_shape=jax.ShapeDtypeStruct((B, head_count, Mp, dvp), jnp.float32),
        grid_spec=pltpu.PrefetchScalarGridSpec(
            num_scalar_prefetch=1,                     # nvalid -> SMEM
            grid=grid,
            in_specs=[
                # keys/values source: streams along the reduction (n) axis.
                pl.BlockSpec((None, tile_n, dk_pad),
                             lambda h, b, m, n, nv: (b, n, 0)),
                # queries source: one tile per (b, m); resident across n.
                pl.BlockSpec((None, tile_m, dq_pad),
                             lambda h, b, m, n, nv: (b, m, 0)),
                # per-head weights: depend only on h -> stay resident in VMEM.
                pl.BlockSpec((dk_pad, mdp), lambda h, b, m, n, nv: (0, h)),
                pl.BlockSpec((dq_pad, mdp), lambda h, b, m, n, nv: (0, h)),
                pl.BlockSpec((dk_pad, dvp), lambda h, b, m, n, nv: (0, h)),
            ],
            out_specs=pl.BlockSpec((None, None, tile_m, dvp),
                                   lambda h, b, m, n, nv: (b, h, m, 0)),
            scratch_shapes=[
                pltpu.VMEM((tile_m, mdp), first.dtype),   # normalized / scaled Q
                pltpu.VMEM((tile_m, 1), jnp.float32),     # exp-sum denominator
                pltpu.VMEM((tile_m, dvp), jnp.float32),   # exp(logits) @ V accum
            ]),
        compiler_params=pltpu.CompilerParams(
            dimension_semantics=("parallel", "parallel", "parallel", "arbitrary"),
            vmem_limit_bytes=48 * 1024 * 1024),
    )(nvalid, first, second, kw, qw, vw)


# ----------------------------------------------------------------------------
# Pure-JAX reference mirroring the torch forward literally (for validation).
# ----------------------------------------------------------------------------
def _reference_one_batch(first_app, second_app, p, *, head_count, app_mdim_total, app_dim):
    md = app_mdim_total // head_count
    dv = app_dim // head_count
    N = first_app.shape[0]
    M = second_app.shape[0]
    Vf = (first_app @ p["Vw"] + p["Vb"]).reshape(1, N, head_count, dv).transpose(2, 0, 1, 3)
    Qf = (second_app @ p["Qw"] + p["Qb"]).reshape(M, 1, head_count, md).transpose(2, 0, 1, 3)
    Kf = (first_app @ p["Kw"] + p["Kb"]).reshape(1, N, head_count, md).transpose(2, 0, 1, 3)
    Qn = jnp.linalg.norm(Qf, axis=3).reshape(head_count, M, 1, 1)
    Qf = Qf / Qn
    A = jnp.sum(Qf * Kf / md, axis=3)                       # (H, M, N)
    w = jnp.exp(A)
    w = w / jnp.sum(w, axis=2).reshape(head_count, M, 1)
    w = w.reshape(head_count, M, N, 1)
    Vout = jnp.sum(Vf * w, axis=2)                          # (H, M, dv)
    return Vout.transpose(1, 0, 2).reshape(M, app_dim)


# ----------------------------------------------------------------------------
# Module glue.
# ----------------------------------------------------------------------------
def _pad_weight_headwise(W, b, in_dim, in_pad, heads, d, dp):
    """(in_dim, heads*d) weight + (heads*d,) bias -> (in_pad, heads*dp) float32.
    Per-head column blocks are zero lane-padded to dp (multiple of 128) and the
    bias is folded in as row `in_dim` (activations carry a matching ones column),
    so each projection is a single bias-free matmul in the kernel."""
    W = np.asarray(W, np.float32)
    b = np.asarray(b, np.float32)
    out = np.zeros((in_pad, heads * dp), np.float32)
    for h in range(heads):
        out[:in_dim, h * dp:h * dp + d] = W[:, h * d:(h + 1) * d]
        out[in_dim, h * dp:h * dp + d] = b[h * d:(h + 1) * d]
    return jnp.asarray(out)


class RelationAttentionPallas:
    """JAX/Pallas port of RelationAttention.  Linear weights are stored as
    (in_features, out_features) (transposed w.r.t. torch's nn.Linear.weight)."""

    def __init__(self, first_app_dim, second_app_dim, app_dim, pos_dim,
                 first_type, second_type, head_count=1, app_mdim=1024, *,
                 key, compute_dtype=jnp.bfloat16, tile_n=512, tile_m=128):
        self.head_count = head_count
        self.first_type = first_type
        self.second_type = second_type
        self.first_app_dim = first_app_dim
        self.second_app_dim = second_app_dim
        self.app_dim = app_dim
        self.pos_dim = pos_dim                    # geometry path is dead code in torch
        self.app_mdim_total = app_mdim
        self.md = app_mdim // head_count          # torch's self.app_mdim (per head)
        self.dv = app_dim // head_count
        self.mdp = _round_up(self.md, 128)        # lane-padded per-head dims
        self.dvp = _round_up(self.dv, 128)
        self.in_k = app_dim * first_app_dim
        self.in_q = app_dim * second_app_dim
        self.dk_pad = _round_up(self.in_k + 1, 128)   # +1: ones column (bias fold)
        self.dq_pad = _round_up(self.in_q + 1, 128)
        self.compute_dtype = compute_dtype
        self.tile_n_target = _round_up(tile_n, 8)
        self.tile_m_target = _round_up(tile_m, 8)

        def linear_init(k, fan_in, fan_out):
            kw_, kb_ = jax.random.split(k)
            bound = 1.0 / np.sqrt(fan_in)
            w = jax.random.uniform(kw_, (fan_in, fan_out), jnp.float32, -bound, bound)
            bvec = jax.random.uniform(kb_, (fan_out,), jnp.float32, -bound, bound)
            return w, bvec

        k1, k2, k3 = jax.random.split(key, 3)
        Kw, Kb = linear_init(k1, self.in_k, app_mdim)
        Qw, Qb = linear_init(k2, self.in_q, app_mdim)
        Vw, Vb = linear_init(k3, self.in_k, app_dim)
        self.params = dict(Kw=Kw, Kb=Kb, Qw=Qw, Qb=Qb, Vw=Vw, Vb=Vb)

        # Head-blocked, lane-padded kernel weights (f32 master; cast at call time).
        self.kw_pad = _pad_weight_headwise(Kw, Kb, self.in_k, self.dk_pad,
                                           head_count, self.md, self.mdp)
        self.qw_pad = _pad_weight_headwise(Qw, Qb, self.in_q, self.dq_pad,
                                           head_count, self.md, self.mdp)
        self.vw_pad = _pad_weight_headwise(Vw, Vb, self.in_k, self.dk_pad,
                                           head_count, self.dv, self.dvp)

    # --- preprocess (host-side glue) -----------------------------------------
    # TODO(synk): the position outputs feed calculate_geometry, which returns None
    # in the torch code (dead path) -- positions are therefore omitted here.
    def preprocess(self, item, item_type, image_infos):
        B = len(image_infos)
        if item_type == "context":
            x = jnp.asarray(item)                                    # (B, C, H, W)
            Bc, C, H, W = x.shape
            app = jnp.transpose(x.reshape(Bc, C, H * W), (0, 2, 1))  # (B, HW, C)
            return [app[b] for b in range(B)]
        elif item_type == "bbox":
            all_app, all_pos = item
            all_app = jnp.asarray(all_app)
            pos_np = np.asarray(all_pos)
            apps = []
            for b_ix in range(B):
                inds = np.nonzero(pos_np[:, 0] == b_ix)[0]
                if inds.shape[0] == 0:
                    apps.append(None)
                    continue
                apps.append(all_app[inds].reshape(inds.shape[0], -1))
            return apps
        raise ValueError("Unrecognized type: " + str(item_type))

    # --- Pallas forward --------------------------------------------------------
    def forward(self, first, second, image_infos):
        B = len(image_infos)
        first_app = self.preprocess(first, self.first_type, image_infos)
        second_app = self.preprocess(second, self.second_type, image_infos)
        n_sizes = [0 if a is None else int(a.shape[0]) for a in first_app]
        m_sizes = [0 if a is None else int(a.shape[0]) for a in second_app]
        n_max, m_max = max(n_sizes), max(m_sizes)
        if n_max == 0 or m_max == 0:
            return [None] * B

        tile_n = min(self.tile_n_target, _round_up(n_max, 8))
        tile_m = min(self.tile_m_target, _round_up(m_max, 8))
        Np = _round_up(n_max, tile_n)
        Mp = _round_up(m_max, tile_m)

        cd = self.compute_dtype
        # Zero-padded batch stacks with a ones column (bias fold) on valid rows.
        first_stack = jnp.zeros((B, Np, self.dk_pad), cd)
        second_stack = jnp.zeros((B, Mp, self.dq_pad), cd)
        for b in range(B):
            if first_app[b] is not None:
                nb = n_sizes[b]
                first_stack = first_stack.at[b, :nb, :self.in_k].set(
                    first_app[b].astype(cd))
                first_stack = first_stack.at[b, :nb, self.in_k].set(1.0)
            if second_app[b] is not None:
                mb = m_sizes[b]
                second_stack = second_stack.at[b, :mb, :self.in_q].set(
                    second_app[b].astype(cd))
                second_stack = second_stack.at[b, :mb, self.in_q].set(1.0)
        nvalid = jnp.asarray(n_sizes, jnp.int32)

        out = _batched_relation_attention(
            nvalid, first_stack, second_stack,
            self.kw_pad.astype(cd), self.qw_pad.astype(cd), self.vw_pad.astype(cd),
            head_count=self.head_count, md=self.md, mdp=self.mdp, dvp=self.dvp,
            tile_n=tile_n, tile_m=tile_m,
            approx_recip=bool(np.dtype(cd) != np.dtype(jnp.float32)))

        feats = []
        for b in range(B):
            if first_app[b] is None or second_app[b] is None:
                feats.append(None)
                continue
            fb = out[b, :, :m_sizes[b], :self.dv]                  # (H, M_b, dv)
            feats.append(jnp.transpose(fb, (1, 0, 2)).reshape(m_sizes[b], self.app_dim))
        return feats

    # --- pure-JAX reference (mirrors the torch forward) -----------------------
    def forward_reference(self, first, second, image_infos):
        B = len(image_infos)
        first_app = self.preprocess(first, self.first_type, image_infos)
        second_app = self.preprocess(second, self.second_type, image_infos)
        outs = []
        for b in range(B):
            fa, sa = first_app[b], second_app[b]
            if fa is None or sa is None:
                outs.append(None)
                continue
            outs.append(_reference_one_batch(
                fa.astype(jnp.float32), sa.astype(jnp.float32), self.params,
                head_count=self.head_count,
                app_mdim_total=self.app_mdim_total, app_dim=self.app_dim))
        return outs


class BBRelationAttentionPallas(RelationAttentionPallas):
    def __init__(self, first_app_dim, second_app_dim, app_dim,
                 head_count=1, app_mdim=1024, **kw):
        super().__init__(first_app_dim, second_app_dim, app_dim, 4 * 64,
                         "bbox", "bbox", head_count, app_mdim, **kw)


class CBRelationAttentionPallas(RelationAttentionPallas):
    def __init__(self, first_app_dim, second_app_dim, app_dim,
                 head_count=1, app_mdim=256, **kw):
        super().__init__(first_app_dim, second_app_dim, app_dim, 4 * 64,
                         "context", "bbox", head_count, app_mdim, **kw)


class MultiRelationAttentionPallas:
    """Port of MultiRelationAttention.forward: rois_feature is gated by
    sigmoid(attention) from the bbox-bbox and context-bbox attentions."""

    def __init__(self, cfg, *, key, compute_dtype=jnp.bfloat16):
        kb, kc = jax.random.split(key)
        self.bbox = None
        self.context = None
        if cfg.get("bb_attention") is not None:
            self.bbox = BBRelationAttentionPallas(
                **cfg["bb_attention"], key=kb, compute_dtype=compute_dtype)
        if cfg.get("cb_attention") is not None:
            self.context = CBRelationAttentionPallas(
                **cfg["cb_attention"], key=kc, compute_dtype=compute_dtype)

    def set_compute_dtype(self, dtype):
        for m in (self.bbox, self.context):
            if m is not None:
                m.compute_dtype = dtype

    def forward(self, cfg, *, use_reference=False):
        ori = jnp.asarray(cfg["rois_feature"], jnp.float32)        # (R, C, S)
        rois = cfg["rois"]
        rois_np = np.asarray(rois)
        image_info = cfg["image_info"]
        B = len(image_info)

        def apply_stage(ori, module, first):
            run = module.forward_reference if use_reference else module.forward
            feats = run(first, (ori, rois), image_info)
            # TODO(synk): torch mutates cfg['rois_feature'] in place; we thread the
            # updated array through instead (same values reach the next stage).
            for b_ix in range(B):
                inds = np.nonzero(rois_np[:, 0] == b_ix)[0]
                if inds.shape[0] == 0 or feats[b_ix] is None:
                    continue
                gate = jax.nn.sigmoid(feats[b_ix].astype(jnp.float32))   # (N_b, C)
                ori = ori.at[inds].set(ori[inds] * gate[:, :, None])
            return ori

        if self.bbox is not None:
            ori = apply_stage(ori, self.bbox, (ori, rois))
        if self.context is not None:
            ori = apply_stage(ori, self.context, jnp.asarray(cfg["context"], jnp.float32))
        return ori


# ----------------------------------------------------------------------------
if __name__ == "__main__":
    key = jax.random.PRNGKey(0)
    k_mod, k_roi, k_box, k_ctx = jax.random.split(key, 4)

    # Small-but-representative config.
    B = 2
    app_dim = 8                 # channel dim of rois_feature (= attention output dim)
    sub_dim = 2                 # first/second_app_dim of the bbox features
    head_count = 2
    app_mdim = 256              # -> 128 per head (lane aligned)

    rois_per_batch = [6, 10]    # ragged ROI counts -> exercises the nvalid key mask
    R = sum(rois_per_batch)
    rois_feature = jax.random.normal(k_roi, (R, app_dim, sub_dim), jnp.float32)
    batch_ids = np.concatenate(
        [np.full((n,), b, np.float32) for b, n in enumerate(rois_per_batch)])
    boxes = jax.random.uniform(k_box, (R, 4), jnp.float32, 0.0, 100.0)
    rois = jnp.concatenate([jnp.asarray(batch_ids)[:, None], boxes], axis=1)   # (R, 5)

    Hc = Wc = 32                # context spatial -> N = 1024 keys (2 N-tiles of 512)
    C_ctx = app_dim * sub_dim   # 16 channels
    context = jax.random.normal(k_ctx, (B, C_ctx, Hc, Wc), jnp.float32)
    image_info = [(640.0, 480.0), (512.0, 384.0)]

    module_cfg = dict(
        bb_attention=dict(first_app_dim=sub_dim, second_app_dim=sub_dim,
                          app_dim=app_dim, head_count=head_count, app_mdim=app_mdim),
        cb_attention=dict(first_app_dim=sub_dim, second_app_dim=sub_dim,
                          app_dim=app_dim, head_count=head_count, app_mdim=app_mdim),
    )
    inputs = dict(rois_feature=rois_feature, rois=rois, context=context,
                  image_info=image_info)

    mra = MultiRelationAttentionPallas(module_cfg, key=k_mod,
                                       compute_dtype=jnp.bfloat16)

    # Pure-JAX reference of the whole MultiRelationAttention forward.
    ref = jax.block_until_ready(mra.forward(inputs, use_reference=True))

    # 1) default fast path: bf16 MXU inputs, f32 accumulation / f32 softmax.
    out_bf16 = jax.block_until_ready(mra.forward(inputs))
    np.testing.assert_allclose(np.asarray(out_bf16), np.asarray(ref),
                               rtol=5e-2, atol=5e-2)

    # 2) float32 mode: tight check that the kernel keeps the module semantics.
    mra.set_compute_dtype(jnp.float32)
    out_f32 = jax.block_until_ready(mra.forward(inputs))
    np.testing.assert_allclose(np.asarray(out_f32), np.asarray(ref),
                               rtol=5e-3, atol=5e-3)

    # 3) direct check of the raw (pre-gating) context-bbox attention features.
    cb = mra.context
    feats_pl = cb.forward(context, (rois_feature, rois), image_info)
    feats_ref = cb.forward_reference(context, (rois_feature, rois), image_info)
    for fp, fr in zip(feats_pl, feats_ref):
        np.testing.assert_allclose(np.asarray(jax.block_until_ready(fp)),
                                   np.asarray(fr), rtol=5e-3, atol=5e-3)

    print("KERNEL_OK")
</pallas_src>

<mosaic_0001>
module attributes {stable_mosaic.version = 11 : i64} {
  func.func @_relation_attention_kernel(%arg0: i32, %arg1: i32, %arg2: i32, %arg3: i32, %arg4: memref<2xi32, #tpu.memory_space<smem>>, %arg5: memref<1x16x128xbf16, #tpu.memory_space<vmem>>, %arg6: memref<1x16x128xbf16, #tpu.memory_space<vmem>>, %arg7: memref<128x128xbf16, #tpu.memory_space<vmem>>, %arg8: memref<128x128xbf16, #tpu.memory_space<vmem>>, %arg9: memref<128x128xbf16, #tpu.memory_space<vmem>>, %arg10: memref<1x1x16x128xf32, #tpu.memory_space<vmem>>, %arg11: memref<16x128xbf16, #tpu.memory_space<vmem>>, %arg12: memref<16x1xf32, #tpu.memory_space<vmem>>, %arg13: memref<16x128xf32, #tpu.memory_space<vmem>>) attributes {dimension_semantics = [#tpu.dimension_semantics<parallel>, #tpu.dimension_semantics<parallel>, #tpu.dimension_semantics<parallel>, #tpu.dimension_semantics<arbitrary>], iteration_bounds = array<i64: 2, 2, 1, 1>, scalar_prefetch = 1 : i64, scratch_operands = 3 : i64, tpu.core_type = #tpu.core_type<tc>, window_params = [{transform_indices = @transform_0, window_bounds = array<i64: 1, 16, 128>}, {transform_indices = @transform_1, window_bounds = array<i64: 1, 16, 128>}, {transform_indices = @transform_2, window_bounds = array<i64: 128, 128>}, {transform_indices = @transform_3, window_bounds = array<i64: 128, 128>}, {transform_indices = @transform_4, window_bounds = array<i64: 128, 128>}, {transform_indices = @transform_5, window_bounds = array<i64: 1, 1, 16, 128>}]} {
    %c0_i32 = arith.constant 0 : i32
    %0 = arith.cmpi eq, %arg3, %c0_i32 : i32
    %1 = arith.extui %0 : i1 to i32
    %c0_i32_0 = arith.constant 0 : i32
    %2 = arith.cmpi ne, %1, %c0_i32_0 : i32
    scf.if %2 {
      %c0_24 = arith.constant 0 : index
      %c0_25 = arith.constant 0 : index
      %c0_26 = arith.constant 0 : index
      %37 = vector.load %arg6[%c0_24, %c0_25, %c0_26] : memref<1x16x128xbf16, #tpu.memory_space<vmem>>, vector<1x16x128xbf16>
      %38 = vector.shape_cast %37 : vector<1x16x128xbf16> to vector<16x128xbf16>
      %c0_27 = arith.constant 0 : index
      %c0_28 = arith.constant 0 : index
      %39 = vector.load %arg8[%c0_27, %c0_28] : memref<128x128xbf16, #tpu.memory_space<vmem>>, vector<128x128xbf16>
      %cst_29 = arith.constant dense<0.000000e+00> : vector<16x128xf32>
      %40 = tpu.matmul %38, %39, %cst_29 {dimension_numbers = #tpu.dot_dimension_numbers<[1], [0], [0], [1], [0, 0, 1, 1], [], []>} : vector<16x128xbf16>, vector<128x128xbf16>, vector<16x128xf32> -> vector<16x128xf32>
      %41 = arith.mulf %40, %40 : vector<16x128xf32>
      %cst_30 = arith.constant dense<0.000000e+00> : vector<16xf32>
      %42 = vector.multi_reduction <add>, %41, %cst_30 [1] : vector<16x128xf32> to vector<16xf32>
      %43 = vector.shape_cast %42 : vector<16xf32> to vector<16x1xf32>
      %44 = math.rsqrt %43 : vector<16x1xf32>
      %cst_31 = arith.constant 7.812500e-03 : f32
      %45 = vector.broadcast %cst_31 : f32 to vector<16x1xf32>
      %46 = arith.mulf %44, %45 : vector<16x1xf32>
      %47 = vector.broadcast %46 : vector<16x1xf32> to vector<16x128xf32>
      %48 = arith.mulf %40, %47 : vector<16x128xf32>
      %49 = arith.truncf %48 : vector<16x128xf32> to vector<16x128xbf16>
      %c0_32 = arith.constant 0 : index
      %c0_33 = arith.constant 0 : index
      %50 = vector.load %arg11[%c0_32, %c0_33] : memref<16x128xbf16, #tpu.memory_space<vmem>>, vector<16x128xbf16>
      tpu.vector_store %arg11[%c0_32, %c0_33], %49 {strides = array<i32>} : memref<16x128xbf16, #tpu.memory_space<vmem>>, vector<16x128xbf16>,
      %cst_34 = arith.constant 0.000000e+00 : f32
      %51 = vector.broadcast %cst_34 : f32 to vector<16x1xf32>
      %c0_35 = arith.constant 0 : index
      %c0_36 = arith.constant 0 : index
      %52 = vector.load %arg12[%c0_35, %c0_36] : memref<16x1xf32, #tpu.memory_space<vmem>>, vector<16x1xf32>
      tpu.vector_store %arg12[%c0_35, %c0_36], %51 {strides = array<i32>} : memref<16x1xf32, #tpu.memory_space<vmem>>, vector<16x1xf32>,
      %cst_37 = arith.constant 0.000000e+00 : f32
      %53 = vector.broadcast %cst_37 : f32 to vector<16x128xf32>
      %c0_38 = arith.constant 0 : index
      %c0_39 = arith.constant 0 : index
      %54 = vector.load %arg13[%c0_38, %c0_39] : memref<16x128xf32, #tpu.memory_space<vmem>>, vector<16x128xf32>
      tpu.vector_store %arg13[%c0_38, %c0_39], %53 {strides = array<i32>} : memref<16x128xf32, #tpu.memory_space<vmem>>, vector<16x128xf32>,
    } else {
    }
    %c0 = arith.constant 0 : index
    %c0_1 = arith.constant 0 : index
    %c0_2 = arith.constant 0 : index
    %3 = vector.load %arg5[%c0, %c0_1, %c0_2] : memref<1x16x128xbf16, #tpu.memory_space<vmem>>, vector<1x16x128xbf16>
    %4 = vector.shape_cast %3 : vector<1x16x128xbf16> to vector<16x128xbf16>
    %c0_3 = arith.constant 0 : index
    %c0_4 = arith.constant 0 : index
    %5 = vector.load %arg7[%c0_3, %c0_4] : memref<128x128xbf16, #tpu.memory_space<vmem>>, vector<128x128xbf16>
    %cst = arith.constant dense<0.000000e+00> : vector<16x128xf32>
    %6 = tpu.matmul %4, %5, %cst {dimension_numbers = #tpu.dot_dimension_numbers<[1], [0], [0], [1], [0, 0, 1, 1], [], []>} : vector<16x128xbf16>, vector<128x128xbf16>, vector<16x128xf32> -> vector<16x128xf32>
    %7 = arith.truncf %6 : vector<16x128xf32> to vector<16x128xbf16>
    %c0_5 = arith.constant 0 : index
    %c0_6 = arith.constant 0 : index
    %8 = vector.load %arg9[%c0_5, %c0_6] : memref<128x128xbf16, #tpu.memory_space<vmem>>, vector<128x128xbf16>
    %cst_7 = arith.constant dense<0.000000e+00> : vector<16x128xf32>
    %9 = tpu.matmul %4, %8, %cst_7 {dimension_numbers = #tpu.dot_dimension_numbers<[1], [0], [0], [1], [0, 0, 1, 1], [], []>} : vector<16x128xbf16>, vector<128x128xbf16>, vector<16x128xf32> -> vector<16x128xf32>
    %10 = arith.truncf %9 : vector<16x128xf32> to vector<16x128xbf16>
    %c0_8 = arith.constant 0 : index
    %c0_9 = arith.constant 0 : index
    %11 = vector.load %arg11[%c0_8, %c0_9] : memref<16x128xbf16, #tpu.memory_space<vmem>>, vector<16x128xbf16>
    %cst_10 = arith.constant dense<0.000000e+00> : vector<16x16xf32>
    %12 = tpu.matmul %11, %7, %cst_10 {dimension_numbers = #tpu.dot_dimension_numbers<[1], [1], [0], [0], [0, 0, 1, 0], [], []>} : vector<16x128xbf16>, vector<16x128xbf16>, vector<16x16xf32> -> vector<16x16xf32>
    %13 = math.exp %12 : vector<16x16xf32>
    %c16_i32 = arith.constant 16 : i32
    %14 = arith.muli %arg3, %c16_i32 : i32
    %15 = tpu.iota {dimensions = array<i32: 1>} : vector<16x16xi32>
    %16 = vector.broadcast %14 : i32 to vector<16x16xi32>
    %17 = arith.addi %16, %15 : vector<16x16xi32>
    %18 = arith.index_cast %arg1 : i32 to index
    %19 = memref.load %arg4[%18] : memref<2xi32, #tpu.memory_space<smem>>
    %20 = vector.broadcast %19 : i32 to vector<16x16xi32>
    %21 = arith.cmpi slt, %17, %20 : vector<16x16xi32>
    %cst_11 = arith.constant 0.000000e+00 : f32
    %22 = vector.broadcast %cst_11 : f32 to vector<16x16xf32>
    %23 = arith.select %21, %13, %22 : vector<16x16xi1>, vector<16x16xf32>
    %c0_12 = arith.constant 0 : index
    %c0_13 = arith.constant 0 : index
    %24 = vector.load %arg12[%c0_12, %c0_13] : memref<16x1xf32, #tpu.memory_space<vmem>>, vector<16x1xf32>
    %cst_14 = arith.constant dense<0.000000e+00> : vector<16xf32>
    %25 = vector.multi_reduction <add>, %23, %cst_14 [1] : vector<16x16xf32> to vector<16xf32>
    %26 = vector.shape_cast %25 : vector<16xf32> to vector<16x1xf32>
    %27 = arith.addf %24, %26 : vector<16x1xf32>
    %c0_15 = arith.constant 0 : index
    %c0_16 = arith.constant 0 : index
    %28 = vector.load %arg12[%c0_15, %c0_16] : memref<16x1xf32, #tpu.memory_space<vmem>>, vector<16x1xf32>
    tpu.vector_store %arg12[%c0_15, %c0_16], %27 {strides = array<i32>} : memref<16x1xf32, #tpu.memory_space<vmem>>, vector<16x1xf32>,
    %c0_17 = arith.constant 0 : index
    %c0_18 = arith.constant 0 : index
    %29 = vector.load %arg13[%c0_17, %c0_18] : memref<16x128xf32, #tpu.memory_space<vmem>>, vector<16x128xf32>
    %30 = arith.truncf %23 : vector<16x16xf32> to vector<16x16xbf16>
    %cst_19 = arith.constant dense<0.000000e+00> : vector<16x128xf32>
    %31 = tpu.matmul %30, %10, %cst_19 {dimension_numbers = #tpu.dot_dimension_numbers<[1], [0], [0], [1], [0, 0, 1, 1], [], []>} : vector<16x16xbf16>, vector<16x128xbf16>, vector<16x128xf32> -> vector<16x128xf32>
    %32 = arith.addf %29, %31 : vector<16x128xf32>
    %c0_20 = arith.constant 0 : index
    %c0_21 = arith.constant 0 : index
    %33 = vector.load %arg13[%c0_20, %c0_21] : memref<16x128xf32, #tpu.memory_space<vmem>>, vector<16x128xf32>
    tpu.vector_store %arg13[%c0_20, %c0_21], %32 {strides = array<i32>} : memref<16x128xf32, #tpu.memory_space<vmem>>, vector<16x128xf32>,
    %c0_i32_22 = arith.constant 0 : i32
    %34 = arith.cmpi eq, %arg3, %c0_i32_22 : i32
    %35 = arith.extui %34 : i1 to i32
    %c0_i32_23 = arith.constant 0 : i32
    %36 = arith.cmpi ne, %35, %c0_i32_23 : i32
    scf.if %36 {
      %c0_24 = arith.constant 0 : index
      %c0_25 = arith.constant 0 : index
      %37 = vector.load %arg13[%c0_24, %c0_25] : memref<16x128xf32, #tpu.memory_space<vmem>>, vector<16x128xf32>
      %c0_26 = arith.constant 0 : index
      %c0_27 = arith.constant 0 : index
      %38 = vector.load %arg12[%c0_26, %c0_27] : memref<16x1xf32, #tpu.memory_space<vmem>>, vector<16x1xf32>
      %39 = tpu.reciprocal %38 {approx = true} : vector<16x1xf32> -> vector<16x1xf32>
      %40 = vector.broadcast %39 : vector<16x1xf32> to vector<16x128xf32>
      %41 = arith.mulf %37, %40 : vector<16x128xf32>
      %c0_28 = arith.constant 0 : index
      %c0_29 = arith.constant 0 : index
      %c0_30 = arith.constant 0 : index
      %c0_31 = arith.constant 0 : index
      %42 = vector.load %arg10[%c0_28, %c0_29, %c0_30, %c0_31] : memref<1x1x16x128xf32, #tpu.memory_space<vmem>>, vector<1x1x16x128xf32>
      %43 = vector.shape_cast %42 : vector<1x1x16x128xf32> to vector<16x128xf32>
      %44 = vector.shape_cast %41 : vector<16x128xf32> to vector<1x1x16x128xf32>
      tpu.vector_store %arg10[%c0_28, %c0_29, %c0_30, %c0_31], %44 {strides = array<i32>} : memref<1x1x16x128xf32, #tpu.memory_space<vmem>>, vector<1x1x16x128xf32>,
    } else {
    }
    return
  }
  func.func @transform_0(%arg0: i32, %arg1: i32, %arg2: i32, %arg3: i32, %arg4: memref<2xi32, #tpu.memory_space<smem>>) -> (i32, i32, i32) {
    %c0_i32 = arith.constant 0 : i32
    %c0_i32_0 = arith.constant 0 : i32
    return %arg1, %arg3, %c0_i32 : i32, i32, i32
  }
  func.func @transform_1(%arg0: i32, %arg1: i32, %arg2: i32, %arg3: i32, %arg4: memref<2xi32, #tpu.memory_space<smem>>) -> (i32, i32, i32) {
    %c0_i32 = arith.constant 0 : i32
    %c0_i32_0 = arith.constant 0 : i32
    return %arg1, %arg2, %c0_i32 : i32, i32, i32
  }
  func.func @transform_2(%arg0: i32, %arg1: i32, %arg2: i32, %arg3: i32, %arg4: memref<2xi32, #tpu.memory_space<smem>>) -> (i32, i32) {
    %c0_i32 = arith.constant 0 : i32
    %c0_i32_0 = arith.constant 0 : i32
    return %c0_i32, %arg0 : i32, i32
  }
  func.func @transform_3(%arg0: i32, %arg1: i32, %arg2: i32, %arg3: i32, %arg4: memref<2xi32, #tpu.memory_space<smem>>) -> (i32, i32) {
    %c0_i32 = arith.constant 0 : i32
    %c0_i32_0 = arith.constant 0 : i32
    return %c0_i32, %arg0 : i32, i32
  }
  func.func @transform_4(%arg0: i32, %arg1: i32, %arg2: i32, %arg3: i32, %arg4: memref<2xi32, #tpu.memory_space<smem>>) -> (i32, i32) {
    %c0_i32 = arith.constant 0 : i32
    %c0_i32_0 = arith.constant 0 : i32
    return %c0_i32, %arg0 : i32, i32
  }
  func.func @transform_5(%arg0: i32, %arg1: i32, %arg2: i32, %arg3: i32, %arg4: memref<2xi32, #tpu.memory_space<smem>>) -> (i32, i32, i32, i32) {
    %c0_i32 = arith.constant 0 : i32
    %c0_i32_0 = arith.constant 0 : i32
    return %arg1, %arg0, %arg2, %c0_i32 : i32, i32, i32, i32
  }
}

</mosaic_0001>

<bundles_post_ra>
// kernel: _batched_relation_attention.1
= control target key start
LH: loop header
LB: loop body
LE: loop exit
PB: predicated region body
PF: predicated region fallthrough
CT: control target
= control target key end

     0   :  { %s1836_s21 = smov [#allocation6]   ;;  %s2333_s0 = inlined_call_operand.hbm [shape: s32[2], index: 0, kind: input, shape index: {}]   ;;  %s2334_s1 = inlined_call_operand.hbm [shape: bf16[2,16,128], index: 1, kind: input, shape index: {}]   ;;  %s2335_s2 = inlined_call_operand.hbm [shape: bf16[2,16,128], index: 2, kind: input, shape index: {}]   ;;  %s2336_s3 = inlined_call_operand.hbm [shape: bf16[128,256], index: 3, kind: input, shape index: {}]   ;;  %s2337_s4 = inlined_call_operand.hbm [shape: bf16[128,256], index: 4, kind: input, shape index: {}]   ;;  %s2338_s5 = inlined_call_operand.hbm [shape: bf16[128,256], index: 5, kind: input, shape index: {}]   ;;  %s2339_s6 = inlined_call_operand.hbm [shape: f32[2,2,16,128], index: 6, kind: output, shape index: {}]  }
   0x1   :  { %2368 = sst [smem:[#allocation41_spill]] %s2335_s2 }
   0x2   :  { %2369 = sst [smem:[#allocation42_spill]] %s2337_s4 }
   0x3   :  { %2370 = sst [smem:[#allocation43_spill]] %s2339_s6 }
   0x4   :  { %12 = dma.hbm_to_smem %s2333_s0, 16, %s1836_s21, [#allocation5] }
   0x5   :  { %1758 = dma.done.wait [#allocation5], 16 }
   0x6   :  { %1759 = vsyncadd [#allocation5], 4294967280 }
   0x7   :  { %14 = sfence }
   0x8   :  { %15 = vsyncpa [#allocation8], 0 }
   0x9   :  { %17 = vsyncpa [#allocation8 + $0x1], 0 }
   0xa   :  { %18 = vsyncpa [#allocation11], 0 }
   0xb   :  { %20 = vsyncpa [#allocation11 + $0x1], 0 }
   0xc   :  { %21 = vsyncpa [#allocation14], 0 }
   0xd   :  { %23 = vsyncpa [#allocation14 + $0x1], 0 }
   0xe   :  { %24 = vsyncpa [#allocation9], 0 }
   0xf   :  { %26 = vsyncpa [#allocation9 + $0x1], 0  ;;  %s1889_s24 = smov 0   ;;  %s1891_s25 = smov 0  }
  0x10   :  { %s1893_s26 = smov 0   ;;  %s1895_s27 = smov 0  }
  0x11   :  { %s1897_s0 = smov 0   ;;  %s1899_s28 = smov 0  }
  0x12   :  { %s1901_s29 = smov 0   ;;  %s1903_s30 = smov 0  }
  0x13   :  { %s1905_s7 = smov 0   ;;  %s1907_s8 = smov 0  }
  0x14   :  { %s1909_s9 = smov 0   ;;  %s1911_s10 = smov 0  }
  0x15   :  { %s1913_s11 = smov 0   ;;  %s1915_s12 = smov 0  }
  0x16 LB: > { %2371 = sst [smem:[#allocation23_spill]] %s1782_s24  ;;  %s1958_s13 = sadd.s32 4294967295, %s1834_s12   ;;  %s1834_s12 = sphi %s1915_s12, %s32_s12   ;;  %s1830_s11 = sphi %s1913_s11, %s2431_s11   ;;  %s1826_s10 = sphi %s1911_s10, %s2436_s10   ;;  %s1822_s9 = sphi %s1909_s9, %s2429_s9   ;;  %s1818_s8 = sphi %s1907_s8, %s2435_s8   ;;  %s1814_s7 = sphi %s1905_s7, %s2434_s7   ;;  %s1810_s30 = sphi %s1903_s30, %s2433_s30   ;;  %s1806_s29 = sphi %s1901_s29, %s2432_s29   ;;  %s1802_s28 = sphi %s1899_s28, %s2427_s28   ;;  %s1798_s0 = sphi %s1897_s0, %s2426_s0   ;;  %s1794_s27 = sphi %s1895_s27, %s2425_s27   ;;  %s1790_s26 = sphi %s1893_s26, %s2424_s26   ;;  %s1786_s25 = sphi %s1891_s25, %s2423_s25   ;;  %s1782_s24 = sphi %s1889_s24, %s2422_s24  }
  0x17   : > { %2372 = sst [smem:[#allocation24_spill]] %s1786_s25  ;;  %s1162_s14 = sadd.s32 4294967294, %s1834_s12  }
  0x18   : > { %2373 = sst [smem:[#allocation25_spill]] %s1790_s26  ;;  %s54_s15 = sadd.s32 1, %s1826_s10 }
  0x19   : > { %2374 = sst [smem:[#allocation26_spill]] %s1798_s0  ;;  %s58_s16 = sadd.s32 1, %s1830_s11 }
  0x1a   : > { %2375 = sst [smem:[#allocation27_spill]] %s1802_s28  ;;  %p56_p0 = scmp.ge.s32.totalorder %s54_s15, 2 }
  0x1b   : > { %2376 = sst [smem:[#allocation28_spill]] %s1818_s8  ;;  %s67_s17 = sadd.s32 1, %s1814_s7 }
  0x1c   : > { %2377 = sst [smem:[#allocation29_spill]] %s1822_s9  ;;  %p74_p1 = scmp.ne.s32.totalorder %s1814_s7, %s1810_s30 }
  0x1d   : > { %2378 = sst [smem:[#allocation30_spill]] %s1830_s11  ;;  %p75_p2 = scmp.eq.s32.totalorder %s1834_s12, 0 }
  0x1e   : > { %2379 = sst [smem:[#allocation31_spill]] %s1834_s12  ;;  %s2438_s15 = smov (%p56_p0, %s54_s15), 0 }
  0x1f   : > { %2380 = sst [smem:[#allocation32_spill]] %s1958_s13  ;;  %s2440_s16 = smov (!%p56_p0, %s58_s16), %s1830_s11 }
  0x20   : > { %2381 = sst [smem:[#allocation33_spill]] %s2438_s15  ;;  %s62_s18 = ssub.s32 %s1826_s10, %s2438_s15 }
  0x21   : > { %p1974_p3 = por %p75_p2, %p74_p1  ;;  %p60_p4 = scmp.ge.s32.totalorder %s2440_s16, 2 }
  0x22   : > { %p65_p5 = scmp.eq.s32.totalorder %s62_s18, 0  ;;  %p80_p6 = scmp.ne.s32.totalorder %s1810_s30, %s1806_s29 }
  0x23   : > { %p2351_p7 = scmp.eq.s32.totalorder %s1958_s13, 0  ;;  %s2442_s16 = smov (%p60_p4, %s2440_s16), 0 }
  0x24   : > { %2383 = sst [smem:[#allocation34_spill]] %s2442_s16  ;;  %s1993_s22 = ssub.s32 %s1830_s11, %s2442_s16 }
  0x25   : > { %s1983_s20 = scalar_select %p65_p5, %s1814_s7, %s67_s17  }
  0x26   : > { %p1987_p8 = por %p2351_p7, %p80_p6  ;;  %p119_p9 = scmp.eq.s32.totalorder %s1993_s22, 0 }
  0x27   : > { %2384 = sst [smem:[#allocation35_spill]] %s1983_s20  ;;  %s198_s23 = sor.u32 %s1993_s22, %s62_s18 }
  0x28   : > { %p201_p10 = scmp.eq.s32.totalorder %s198_s23, 0  ;;  %s203_s29 = sadd.s32 1, %s1790_s26 }
  0x29   : > { %p213_p11 = scmp.ne.s32.totalorder %s1790_s26, %s1786_s25  ;;  %p214_p12 = scmp.eq.s32.totalorder %s1958_s13, 3 }
  0x2a   : > { %s2002_s17 = scalar_select %p201_p10, %s1790_s26, %s203_s29  }
  0x2b   : > { %p2004_p13 = por %p214_p12, %p213_p11  ;;  %p219_p0 = scmp.ne.s32.totalorder %s1786_s25, %s1782_s24 }
  0x2c   : > { %2386 = sst [smem:[#allocation36_spill]] %s2002_s17  ;;  %p220_p1 = scmp.eq.s32.totalorder %s1162_s14, 3 }
  0x2d   : > { %s2387_s15 = scalar_select %p2004_p13, 1, 0 }
  0x2e   : > { %p2350_p4 = scmp.lt.s32.totalorder %s1834_s12, 4  ;;  %s2346_s16 = sand.u32 1, %s1814_s7  }
  0x2f   : > { %2388 = sst [smem:[#allocation37_spill]] %s2387_s15  ;;  %p2012_p5 = por %p220_p1, %p219_p0 }
  0x30   : > { %s2018_s18 = sshll.u32 %s2346_s16, 3  ;;  %s2353_s23 = sshll.u32 %s1826_s10, 7 }
  0x31   : > { %s2389_s20 = scalar_select %p2012_p5, 1, 0 }
  0x32   : > { %p2025_p6 = pnand %p2350_p4, %p1974_p3  ;;  %s263_s14 = sand.u32 1, %s1834_s12  }
  0x33   : > { %2390 = sst [smem:[#allocation38_spill]] %s2389_s20  ;;  %s267_s20 = scalar_lea.vmem [#allocation10], %s2018_s18 }
  0x34   : > { %s2392_s2 = sld [smem:[#allocation41_spill]]  ;;  %s276_s6 = sshll.u32 %s267_s20, 4  ;;  %s277_s6 = int_to_ptr.vmem [resolvable:$true] %s276_s6 }
  0x35   : > { %s2038_s16 = scalar_lea.sflag [#allocation11], %s263_s14  ;;  %p2352_p10 = pneg %p2025_p6 }
  0x36   : > { %s1549_s19 = scalar_lea.vmem %s277_s6, 128  ;;  %s1837_s15 = smov [#allocation10]  }
  0x37   : > { %p1550_p3 = scmp.ne.s32.totalorder %s277_s6, %s1549_s19  ;;  %s1554_s9 = sshll.u32 %s1837_s15, 4  ;;  %s1555_s9 = int_to_ptr.vmem [resolvable:$false] %s1554_s9 }
  0x38   : > { %s1556_s25 = scalar_lea.vmem %s1555_s9, 256  ;;  %p1557_p0 = scmp.lt.s32.totalorder %s277_s6, %s1555_s9 }
  0x39   : > { %p1552_p11 = pnand %p1550_p3, %p2352_p10  ;;  %p1558_p1 = scmp.lt.s32.totalorder %s1556_s25, %s1549_s19 }
  0x3a   : > { %s275_s24 = scalar_lea.hbm %s2392_s2, %s2353_s23 }
  0x3b   : > { %p1553_p12 = pneg %p1552_p11  ;;  %p1559_p4 = por %p1558_p1, %p1557_p0 }
  0x3d   : > { %p1560_p7 = pnand %p1559_p4, %p1553_p12 }
  0x3f   : > { %1563 = shalt.err (!%p1560_p7)
}
  0x40   : > { %s2354_s26 = smov 64   ;;  %s2356_s25 = smov 4  }
  0x41   : > { %1350 = dma.hbm_to_vmem [thread:$0]  (!%p2025_p6), %s275_s24, 128, %s277_s6, %s2038_s16, %s2354_s26, %s2354_s26, %s2356_s25  }
  0x42   : > { %p1177_p7 = scmp.ge.s32.totalorder %s1834_s12, 1  ;;  %p344_p4 = scmp.lt.s32.totalorder %s1834_s12, 5 }
  0x43   : > { %s121_s15 = sadd.s32 1, %s1802_s28  ;;  %p128_p11 = scmp.ne.s32.totalorder %s1802_s28, %s1798_s0 }
  0x44   : > { %p2053_p3 = pnand %p1177_p7, %p344_p4  ;;  %p134_p12 = scmp.ne.s32.totalorder %s1798_s0, %s1794_s27 }
  0x45   : > { %s2061_s20 = scalar_select %p119_p9, %s1802_s28, %s121_s15  }
  0x46   : > { %s288_s17 = sand.u32 1, %s1802_s28   ;;  %s2069_s19 = sshll.u32 %s1830_s11, 6 }
  0x47   : > { %2394 = sst [smem:[#allocation39_spill]] %s2061_s20  ;;  %p130_p0 = por %p128_p11, %p75_p2 }
  0x48   : > { %p2395_p1 = scmp.eq.s32.totalorder %s1958_s13, 0  ;;  %s2079_s24 = sshll.u32 %s288_s17, 6 }
  0x49   : > { %p2398_p7 = scmp.lt.s32.totalorder %s1834_s12, 4  ;;  %s2400_s4 = sld [smem:[#allocation42_spill]] }
  0x4a   : > { %p2075_p10 = por %p134_p12, %p2395_p1  ;;  %s310_s26 = scalar_lea.vmem [#allocation13], %s2079_s24 }
  0x4b   : > { %p2083_p4 = pnand %p2398_p7, %p130_p0  ;;  %s316_s25 = sshll.u32 %s310_s26, 4  ;;  %s317_s25 = int_to_ptr.vmem [resolvable:$true] %s316_s25 }
  0x4c   : > { %s2396_s6 = scalar_select %p2075_p10, 1, 0 }
  0x4d   : > { %s2094_s2 = scalar_lea.sflag [#allocation14], %s263_s14  ;;  %p2367_p2 = pneg %p2083_p4 }
  0x4e   : > { %2397 = sst [smem:[#allocation40_spill]] %s2396_s6  ;;  %s1577_s17 = scalar_lea.vmem %s317_s25, 1024 }
  0x4f   : > { %s315_s23 = scalar_lea.hbm %s2400_s4, %s2069_s19  ;;  %p1578_p9 = scmp.ne.s32.totalorder %s317_s25, %s1577_s17 }
  0x50   : > { %s1840_s11 = smov [#allocation13]  }
  0x51   : > { %p1580_p11 = pnand %p1578_p9, %p2367_p2  ;;  %s1582_s20 = sshll.u32 %s1840_s11, 4  ;;  %s1583_s20 = int_to_ptr.vmem [resolvable:$false] %s1582_s20 }
  0x52   : > { %s1584_s27 = scalar_lea.vmem %s1583_s20, 2048  ;;  %p1585_p0 = scmp.lt.s32.totalorder %s317_s25, %s1583_s20 }
  0x53   : > { %p1581_p12 = pneg %p1580_p11  ;;  %p1586_p1 = scmp.lt.s32.totalorder %s1584_s27, %s1577_s17 }
  0x55   : > { %p1587_p7 = por %p1586_p1, %p1585_p0 }
  0x57   : > { %p1588_p5 = pnand %p1587_p7, %p1581_p12 }
  0x59   : > { %1591 = shalt.err (!%p1588_p5)
}
  0x5a   : > { %s1841_s26 = smov 128   ;;  %s2401_s14 = smov 4  }
  0x5b   : > { %s2402_s15 = smov 64   ;;  %s2403_s11 = sshll.u32 %s1826_s10, 7 }
  0x5c   : > { %1356 = dma.hbm_to_vmem [thread:$0]  (!%p2083_p4), %s315_s23, 1024, %s317_s25, %s2094_s2, %s1841_s26, %s2402_s15, %s2401_s14  }
  0x5d   : > { %s252_s20 = scalar_lea.hbm %s2334_s1, %s2403_s11  ;;  %s244_s17 = scalar_lea.vmem [#allocation7], %s2018_s18 }
  0x5e   : > { %s253_s27 = sshll.u32 %s244_s17, 4  ;;  %s2404_s12 = sand.u32 1, %s1814_s7   ;;  %s254_s27 = int_to_ptr.vmem [resolvable:$true] %s253_s27 }
  0x5f   : > { %s241_s8 = scalar_lea.sflag [#allocation8], %s2404_s12  ;;  %s1605_s6 = scalar_lea.vmem %s254_s27, 128 }
  0x60   : > { %p1606_p5 = scmp.ne.s32.totalorder %s254_s27, %s1605_s6  ;;  %p2405_p9 = pneg %p2025_p6 }
  0x61   : > { %s1842_s0 = smov [#allocation7]  }
  0x62   : > { %p1608_p11 = pnand %p1606_p5, %p2405_p9  ;;  %s1610_s13 = sshll.u32 %s1842_s0, 4  ;;  %s1611_s13 = int_to_ptr.vmem [resolvable:$false] %s1610_s13 }
  0x63   : > { %s1612_s23 = scalar_lea.vmem %s1611_s13, 256  ;;  %p1613_p0 = scmp.lt.s32.totalorder %s254_s27, %s1611_s13 }
  0x64   : > { %p1609_p12 = pneg %p1608_p11  ;;  %p1614_p1 = scmp.lt.s32.totalorder %s1612_s23, %s1605_s6 }
  0x66   : > { %p1615_p7 = por %p1614_p1, %p1613_p0 }
  0x68   : > { %p1616_p2 = pnand %p1615_p7, %p1609_p12 }
  0x6a   : > { %1619 = shalt.err (!%p1616_p2)
}
  0x6b   : > { %1347 = dma.hbm_to_vmem [thread:$0]  (!%p2025_p6), %s252_s20, 128, %s254_s27, %s241_s8, %s2402_s15, %s2402_s15, %s2401_s14  }
  0x6c   : > { %s295_s0 = scalar_lea.hbm %s2336_s3, %s2069_s19  ;;  %s290_s12 = scalar_lea.vmem [#allocation12], %s2079_s24 }
  0x6d   : > { %s296_s18 = sshll.u32 %s290_s12, 4  ;;  %p2406_p2 = pneg %p2083_p4  ;;  %s297_s18 = int_to_ptr.vmem [resolvable:$true] %s296_s18 }
  0x6e   : > { %s1633_s13 = scalar_lea.vmem %s297_s18, 1024  ;;  %s1843_s29 = smov [#allocation12]  }
  0x6f   : > { %p1634_p5 = scmp.ne.s32.totalorder %s297_s18, %s1633_s13  ;;  %s1638_s25 = sshll.u32 %s1843_s29, 4  ;;  %s1639_s25 = int_to_ptr.vmem [resolvable:$false] %s1638_s25 }
  0x70   : > { %s1640_s6 = scalar_lea.vmem %s1639_s25, 2048  ;;  %p1641_p12 = scmp.lt.s32.totalorder %s297_s18, %s1639_s25 }
  0x71   : > { %p1636_p9 = pnand %p1634_p5, %p2406_p2  ;;  %p1642_p0 = scmp.lt.s32.totalorder %s1640_s6, %s1633_s13 }
  0x73   : > { %p1637_p11 = pneg %p1636_p9  ;;  %p1643_p6 = por %p1642_p0, %p1641_p12 }
  0x75   : > { %p1644_p1 = pnand %p1643_p6, %p1637_p11 }
  0x77   : > { %1647 = shalt.err (!%p1644_p1)
}
  0x78   : > { %1353 = dma.hbm_to_vmem [thread:$0]  (!%p2083_p4), %s295_s0, 1024, %s297_s18, %s2038_s16, %s1841_s26, %s2402_s15, %s2401_s14  }
  0x79   : > { %s335_s20 = scalar_lea.hbm %s2338_s5, %s2069_s19  ;;  %s330_s17 = scalar_lea.vmem [#allocation15], %s2079_s24 }
  0x7a   : > { %s336_s27 = sshll.u32 %s330_s17, 4  ;;  %p2407_p5 = pmov %p2406_p2  ;;  %s337_s27 = int_to_ptr.vmem [resolvable:$true] %s336_s27 }
  0x7b   : > { %s1661_s23 = scalar_lea.vmem %s337_s27, 1024  ;;  %s1844_s4 = smov [#allocation15]  }
  0x7c   : > { %p1662_p7 = scmp.ne.s32.totalorder %s337_s27, %s1661_s23  ;;  %s1666_s28 = sshll.u32 %s1844_s4, 4  ;;  %s1667_s28 = int_to_ptr.vmem [resolvable:$false] %s1666_s28 }
  0x7d   : > { %s1668_s12 = scalar_lea.vmem %s1667_s28, 2048  ;;  %p1669_p11 = scmp.lt.s32.totalorder %s337_s27, %s1667_s28 }
  0x7e   : > { %p1664_p2 = pnand %p1662_p7, %p2407_p5  ;;  %p1670_p12 = scmp.lt.s32.totalorder %s1668_s12, %s1661_s23 }
  0x80   : > { %p1665_p9 = pneg %p1664_p2  ;;  %p1671_p0 = por %p1670_p12, %p1669_p11 }
  0x82   : > { %p1672_p6 = pnand %p1671_p0, %p1665_p9 }
  0x84   : > { %1675 = shalt.err (!%p1672_p6)
}
  0x85   : > { %1359 = dma.hbm_to_vmem [thread:$0]  (!%p2083_p4), %s335_s20, 1024, %s337_s27, %s2094_s2, %s1841_s26, %s2402_s15, %s2401_s14  }
  0x86   : > { %348 = sbr.rel (%p2053_p3) target bundleno = 1077 (0x435), region = 40  ;;  %s350_s16 = sand.u32 (!%p2053_p3), 1, %s1810_s30  }
  0x87   : > { %s2154_s19 = sshll.u32 (!%p2053_p3), %s350_s16, 3  ;;  %s351_s24 = scalar_lea.sflag (!%p2053_p3), [#allocation8], %s350_s16 }
  0x88   : > { %s354_s0 = scalar_lea.vmem (!%p2053_p3), [#allocation7], %s2154_s19 }
  0x8b   : > { %1761 = dma.done.wait (%p1987_p8), %s351_s24, 128  }
  0x8c   : > { %1763 = vsyncadd (%p1987_p8), %s351_s24, 4294967168  ;;  %s2408_s22 = sld [smem:[#allocation32_spill]]  ;;  %s363_s9 = scalar_lea.vmem [#allocation10], %s2154_s19 }
  0x92   : > { %s359_s2 = sand.u32 1, %s2408_s22  }
  0x93   : > { %s360_s26 = scalar_lea.sflag [#allocation11], %s359_s2 }
  0x94   : > { %1765 = dma.done.wait (%p1987_p8), %s360_s26, 128  }
  0x95   : > { %1767 = vsyncadd (%p1987_p8), %s360_s26, 4294967168  ;;  %s2409_s14 = sld [smem:[#allocation26_spill]] }
  0x9b   : > { %s370_s18 = sand.u32 1, %s2409_s14  }
  0x9c   : > { %s2168_s13 = sshll.u32 %s370_s18, 6 }
  0x9d   : > { %s2171_s29 = scalar_lea.vmem [#allocation12], %s2168_s13 }
  0x9e   : > { %1769 = dma.done.wait (%p2075_p10), %s360_s26, 1024  }
  0x9f   : > { %1771 = vsyncadd (%p2075_p10), %s360_s26, 4294966272  ;;  %s378_s25 = scalar_lea.sflag [#allocation14], %s359_s2  ;;  %s2178_s6 = scalar_lea.vmem [#allocation13], %s2168_s13 }
  0xa0   : > { %1773 = dma.done.wait (%p2075_p10), %s378_s25, 2048  }
  0xa1   : > { %1775 = vsyncadd (%p2075_p10), %s378_s25, 4294965248  ;;  %v1845_v0 = vmov 0.0   ;;  %vm1846_vm0 = vmmov 0   ;;  %v1489_v1 = vld [vmem:[%s2178_s6 + $0x38] sm:$0xff]   ;;  %v1490_v2 = vld [vmem:[%s2178_s6 + $0x30] sm:$0xff]   ;;  %s390_s21 = scalar_lea.vmem [#allocation15], %s2168_s13  ;;  %v859_v59 = vlaneseq }
  0xa2   : > { %1260 = vmatprep.subr.bf16.mxu0 %v1845_v0  ;;  %1276 = vmatprep.mubr.msk.bf16.mxu0 %vm1846_vm0, %v1845_v0  ;;  %v1491_v3 = vld [vmem:[%s2178_s6 + $0x28] sm:$0xff]   ;;  %v1498_v4 = vld [vmem:[%s2171_s29 + $0x38] sm:$0xff]   ;;  %v1492_v5 = vld [vmem:[%s2178_s6 + $0x20] sm:$0xff]   ;;  %s2411_s8 = sld [smem:[#allocation28_spill]]  ;;  %vm580_vm1 = vcmask 7168   ;;  %vm870_vm3 = vcmask 130048  }
  0xa3   : > { %1280 = vmatprep.subr.bf16.mxu1 %v1845_v0  ;;  %1296 = vmatprep.mubr.msk.bf16.mxu1 %vm1846_vm0, %v1845_v0  ;;  %v1499_v6 = vld [vmem:[%s2171_s29 + $0x30] sm:$0xff]   ;;  %v1493_v7 = vld [vmem:[%s2178_s6 + $0x18] sm:$0xff]   ;;  %v1500_v8 = vld [vmem:[%s2171_s29 + $0x28] sm:$0xff]   ;;  %581 = vst.msk [vmem:[#allocation3] sm:$0xff] %vm580_vm1, %v1845_v0  ;;  %v860_v60 = vand.u32 127, %v859_v59  ;;  %s2412_s20 = sld [smem:[#allocation24_spill]] }
  0xa4   : > { %1261 = vmatpush3.bf16.msra.mxu0 %v1489_v1  ;;  %1281 = vmatpush3.bf16.msra.mxu1 %v1498_v4  ;;  %v1494_v9 = vld [vmem:[%s2178_s6 + $0x10] sm:$0xff]   ;;  %v1501_v10 = vld [vmem:[%s2171_s29 + $0x20] sm:$0xff]   ;;  %v1495_v11 = vld [vmem:[%s2178_s6 + $0x8] sm:$0xff]   ;;  %582 = vst.msk [vmem:[#allocation3 + $0x8] sm:$0xff] %vm580_vm1, %v1845_v0  ;;  %s2413_s17 = sld [smem:[#allocation29_spill]]  ;;  %s1848_s13 = smov [#allocation16]  }
  0xa5   : > { %1262 = vmatprep.subr.bf16.mxu0 %v1845_v0  ;;  %1282 = vmatprep.subr.bf16.mxu1 %v1845_v0  ;;  %v1502_v12 = vld [vmem:[%s2171_s29 + $0x18] sm:$0xff]   ;;  %v1496_v13 = vld [vmem:[%s2178_s6] sm:$0xff]   ;;  %v1503_v14 = vld [vmem:[%s2171_s29 + $0x10] sm:$0xff]   ;;  %s2415_s26 = sld [smem:[#allocation43_spill]] }
  0xa6   : > { %v1497_v15 = vld [vmem:[%s363_s9] sm:$0xff]   ;;  %v1504_v16 = vld [vmem:[%s2171_s29 + $0x8] sm:$0xff]   ;;  %v1505_v17 = vld [vmem:[%s2171_s29] sm:$0xff]   ;;  %s1680_s29 = sshll.u32 %s1848_s13, 4  ;;  %s1681_s29 = int_to_ptr.vmem [resolvable:$false] %s1680_s29 }
  0xa7   : > { %v1506_v18 = vld [vmem:[%s354_s0] sm:$0xff]   ;;  %v1507_v26 = vld [vmem:[%s390_s21 + $0x38] sm:$0xff]   ;;  %v1508_v29 = vld [vmem:[%s390_s21 + $0x30] sm:$0xff]   ;;  %s1682_s25 = scalar_lea.vmem %s1681_s29, 512 }
  0xa8   : > { %1263 = vmatpush3.bf16.msra.mxu0 %v1490_v2  ;;  %1283 = vmatpush3.bf16.msra.mxu1 %v1499_v6  ;;  %v1509_v32 = vld [vmem:[%s390_s21 + $0x28] sm:$0xff]   ;;  %v1510_v33 = vld [vmem:[%s390_s21 + $0x20] sm:$0xff]   ;;  %v1511_v34 = vld [vmem:[%s390_s21 + $0x18] sm:$0xff]   ;;  %s863_s11 = sld [smem:[#allocation6 + %s2411_s8]]  ;;  %s1216_s4 = sshll.u32 %s2411_s8, 2 }
  0xa9   : > { %1264 = vmatprep.subr.bf16.mxu0 %v1845_v0  ;;  %1284 = vmatprep.subr.bf16.mxu1 %v1845_v0  ;;  %v1513_v35 = vld [vmem:[%s390_s21 + $0x10] sm:$0xff]   ;;  %v1514_v36 = vld [vmem:[%s390_s21 + $0x8] sm:$0xff]   ;;  %v1515_v37 = vld [vmem:[%s390_s21] sm:$0xff]   ;;  %s434_s27 = sand.u32 1, %s2412_s20  }
  0xaa   : > { %v868_v6 = vld [vmem:[#allocation3] sm:$0xff]  ;;  %s1215_s23 = sshll.u32 %s2413_s17, 1  ;;  %s1183_s28 = sshll.u32 %s434_s27, 4 }
  0xab   : > { %s971_s16 = sadd.s32 %s1216_s4, %s1215_s23  ;;  %s436_s19 = scalar_lea.vmem [#allocation16], %s1183_s28 }
  0xac   : > { %1265 = vmatpush3.bf16.msra.mxu0 %v1491_v3  ;;  %1285 = vmatpush3.bf16.msra.mxu1 %v1500_v8  ;;  %s974_s24 = sshll.u32 %s436_s19, 4  ;;  %s1217_s0 = sshll.u32 %s971_s16, 7  ;;  %s2251_s24 = int_to_ptr.vmem [resolvable:$true] %s974_s24 }
  0xad   : > { %1266 = vmatprep.subr.bf16.mxu0 %v1845_v0  ;;  %1286 = vmatprep.subr.bf16.mxu1 %v1845_v0  ;;  %s2416_s14 = smov %s2415_s26  ;;  %s2256_s9 = scalar_lea.hbm %s2415_s26, %s1217_s0 }
  0xae   : > { %v864_v61 = vstv %s863_s11  ;;  %s2258_s15 = scalar_lea.sflag [#allocation9], %s434_s27  ;;  %s1676_s18 = scalar_lea.vmem %s2251_s24, 256 }
  0xaf   : > { %vm865_vm2 = vcmp.lt.s32.totalorder %v860_v60, %v864_v61  ;;  %p1677_p8 = scmp.ne.s32.totalorder %s2251_s24, %s1676_s18  ;;  %p1683_p4 = scmp.lt.s32.totalorder %s2251_s24, %s1681_s29 }
  0xb0   : > { %1267 = vmatpush3.bf16.msra.mxu0 %v1492_v5  ;;  %1287 = vmatpush3.bf16.msra.mxu1 %v1501_v10  ;;  %v1847_v5 = vmov 0   ;;  %p1684_p1 = scmp.lt.s32.totalorder %s1682_s25, %s1676_s18 }
  0xb1   : > { %1268 = vmatprep.subr.bf16.mxu0 %v1845_v0  ;;  %1288 = vmatprep.subr.bf16.mxu1 %v1845_v0  ;;  %p1678_p10 = pnand %p1677_p8, %p2004_p13 }
  0xb2   : > { %1487 = vset.pattern.permute.xlu0 %v1847_v5  ;;  %1488 = vset.pattern.permute.xlu1 %v1847_v5  ;;  %p1685_p7 = por %p1684_p1, %p1683_p4 }
  0xb3   : > { %p1679_p3 = pneg %p1678_p10 }
  0xb4   : > { %1269 = vmatpush3.bf16.msra.mxu0 %v1493_v7  ;;  %1289 = vmatpush3.bf16.msra.mxu1 %v1502_v12 }
  0xb5   : > { %1270 = vmatprep.subr.bf16.mxu0 %v1845_v0  ;;  %1290 = vmatprep.subr.bf16.mxu1 %v1845_v0  ;;  %p1686_p5 = pnand %p1685_p7, %p1679_p3 }
  0xb8   : > { %1271 = vmatpush3.bf16.msra.mxu0 %v1494_v9  ;;  %1291 = vmatpush3.bf16.msra.mxu1 %v1503_v14  ;;  %v869_v9 = vld [vmem:[#allocation3 + $0x8] sm:$0xff] }
  0xb9   : > { %1272 = vmatprep.subr.bf16.mxu0 %v1845_v0  ;;  %1292 = vmatprep.subr.bf16.mxu1 %v1845_v0 }
  0xbc   : > { %1273 = vmatpush3.bf16.msra.mxu0 %v1495_v11  ;;  %1293 = vmatpush3.bf16.msra.mxu1 %v1504_v16 }
  0xbd   : > { %1274 = vmatprep.subr.bf16.mxu0 %v1845_v0  ;;  %1294 = vmatprep.subr.bf16.mxu1 %v1845_v0 }
  0xc0   : > { %1275 = vmatpush3.bf16.msra.mxu0 %v1496_v13  ;;  %1295 = vmatpush3.bf16.msra.mxu1 %v1505_v17 }
  0xc1   : > { %1300 = vmatprep.subr.bf16.mxu0 %v1845_v0  ;;  %1320 = vmatprep.subr.bf16.mxu1 %v1845_v0 }
  0xc3   : > { %1277 = vmatmul.mubr.bf16.vlgmr.msra.gmra.mxu0 %v1497_v15  ;;  %1297 = vmatmul.mubr.bf16.vlgmr.msra.gmra.mxu1 %v1506_v18 }
  0xc4   : > { %1316 = vmatprep.mubr.msk.bf16.mxu0 %vm1846_vm0, %v1845_v0  ;;  %1322 = vmatprep.mubr.msk.bf16.mxu1 %vm1846_vm0, %v1845_v0 }
  0xc5   : > { %1301 = vmatpush3.bf16.msra.mxu0 %v1507_v26 }
  0xc6   : > { %1302 = vmatprep.subr.bf16.mxu0 %v1845_v0 }
  0xc9   : > { %1303 = vmatpush3.bf16.msra.mxu0 %v1508_v29 }
  0xca   : > { %1304 = vmatprep.subr.bf16.mxu0 %v1845_v0 }
  0xcd   : > { %1305 = vmatpush3.bf16.msra.mxu0 %v1509_v32 }
  0xce   : > { %1306 = vmatprep.subr.bf16.mxu0 %v1845_v0 }
  0xd1   : > { %1307 = vmatpush3.bf16.msra.mxu0 %v1510_v33 }
  0xd2   : > { %1308 = vmatprep.subr.bf16.mxu0 %v1845_v0 }
  0xd5   : > { %1309 = vmatpush3.bf16.msra.mxu0 %v1511_v34 }
  0xd6   : > { %1310 = vmatprep.subr.bf16.mxu0 %v1845_v0 }
  0xd9   : > { %1311 = vmatpush3.bf16.msra.mxu0 %v1513_v35 }
  0xda   : > { %1312 = vmatprep.subr.bf16.mxu0 %v1845_v0 }
  0xdd   : > { %1313 = vmatpush3.bf16.msra.mxu0 %v1514_v36 }
  0xde   : > { %1314 = vmatprep.subr.bf16.mxu0 %v1845_v0 }
  0xe1   : > { %1315 = vmatpush3.bf16.msra.mxu0 %v1515_v37 }
  0xe4   : > { %1317 = vmatmul.mubr.bf16.vlgmr.msra.gmra.mxu0 %v1506_v18 }
 0x183   : > { %v551_v19 = vpop.f32.mrf.mxu0  ;;  %v691_v25 = vpop.f32.mrf.mxu1 }
 0x184   : > { %v558_v20 = vmul.f32 %v551_v19, %v551_v19 }
 0x185   : > { %v1278_v21 = vpop.f32.mrf.mxu0  ;;  %v1298_v27 = vpop.f32.mrf.mxu1 }
 0x186   : > { %560 = vadd.xlane.f32.xlu0 %v558_v20 }
 0x187   : > { %v554_v22 = vpop.f32.mrf.mxu0  ;;  %v694_v28 = vpop.f32.mrf.mxu1 }
 0x188   : > { %v559_v23 = vmul.f32 %v554_v22, %v554_v22  ;;  %v698_v31 = vpack.c.bf16 %v694_v28, %v691_v25 }
 0x189   : > { %v1279_v24 = vpop.f32.mrf.mxu0  ;;  %v1299_v30 = vpop.f32.mrf.mxu1 }
 0x18a   : > { %562 = vadd.xlane.f32.xlu0 %v559_v23  ;;  %1321 = vmatpush3.bf16.xpose.msra.mxu1 %v698_v31 }
 0x18b   : > { %1326 = vmatprep.subr.bf16.mxu1 %v1845_v0 }
 0x1a4   : > { %v797_v48 = vpop.f32.mrf.mxu0 }
 0x1a6   : > { %v1318_v49 = vpop.f32.mrf.mxu0 }
 0x1a8   : > { %v800_v50 = vpop.f32.mrf.mxu0 }
 0x1a9   : > { %v804_v51 = vpack.c.bf16 %v800_v50, %v797_v48 }
 0x1aa   : > { %v1319_v52 = vpop.f32.mrf.mxu0 }
 0x20f   : > { %v561_v38 = vpop.xlane.xlu0 %560 }
 0x210   : > { %1516 = vrsqrt.f32 %v561_v38 }
 0x213   : > { %v563_v39 = vpop.xlane.xlu0 %562 }
 0x214   : > { %1518 = vrsqrt.f32 %v563_v39 }
 0x21d   : > { %v1517_v40 = vpop.eup %1516 }
 0x21e   : > { %v566_v41 = vmul.f32 0.0078125, %v1517_v40 }
 0x220   : > { %v568_v44 = vmul.f32 %v566_v41, %v551_v19 }
 0x221   : > { %v1519_v42 = vpop.eup %1518 }
 0x222   : > { %v567_v43 = vmul.f32 0.0078125, %v1519_v42 }
 0x224   : > { %v569_v45 = vmul.f32 %v567_v43, %v554_v22 }
 0x226   : > { %v1227_v46 = vpack.c.bf16 %v569_v45, %v568_v44 }
 0x228   : > { %1228 = vst [vmem:[#allocation2] sm:$0xff] %v1227_v46  }
 0x22f   : > { %v1512_v47 = vld [vmem:[#allocation2] sm:$0xff]  }
 0x230   : > { %1323 = vmatmul.mubr.bf16.vlgmr.msra.gmra.mxu1 %v1512_v47 }
 0x231   : > { %1328 = vmatprep.mubr.msk.bf16.mxu1 %vm1846_vm0, %v1845_v0  ;;  %1327 = vmatpush3.bf16.msra.mxu1 %v804_v51 }
 0x2f0   : > { %v847_v53 = vpop.f32.mrf.mxu1 }
 0x2f1   : > { %v854_v54 = vmul.f32 1.442695, %v847_v53 }
 0x2f2   : > { %v1324_v55 = vpop.f32.mrf.mxu1 }
 0x2f3   : > { %1520 = vpow2.f32 %v854_v54 }
 0x2f4   : > { %v850_v56 = vpop.f32.mrf.mxu1 }
 0x2f5   : > { %v856_v57 = vmul.f32 1.442695, %v850_v56 }
 0x2f6   : > { %v1325_v58 = vpop.f32.mrf.mxu1 }
 0x2f7   : > { %1522 = vpow2.f32 %v856_v57 }
 0x300   : > { %v1521_v62 = vpop.eup %1520 }
 0x301   : > { %v866_v63 = vsel %vm865_vm2, %v1521_v62, 0.0 }
 0x302   : > { %v871_v1 = vsel %vm870_vm3, %v866_v63, 0.0 }
 0x303   : > { %872 = vadd.xlane.f32.xlu1 %v871_v1 }
 0x304   : > { %v1523_v2 = vpop.eup %1522 }
 0x305   : > { %v867_v0 = vsel %vm865_vm2, %v1523_v2, 0.0 }
 0x306   : > { %v874_v3 = vsel %vm870_vm3, %v867_v0, 0.0  ;;  %v884_v4 = vpack.c.bf16 %v867_v0, %v866_v63 }
 0x307   : > { %875 = vadd.xlane.f32.xlu1 %v874_v3 }
 0x308   : > { %1329 = vmatmul.mubr.msk.bf16.vlgmr.msra.gmra.mxu1 %vm870_vm3, %v884_v4 }
 0x38c   : > { %v873_v7 = vpop.xlane.xlu1 %872 }
 0x38d   : > { %v877_v8 = vadd.f32 %v873_v7, %v868_v6 }
 0x38f   : > { %880 = vst.msk [vmem:[#allocation3] sm:$0xff] %vm580_vm1, %v877_v8 }
 0x390   : > { %v876_v10 = vpop.xlane.xlu1 %875 }
 0x391   : > { %v878_v11 = vadd.f32 %v876_v10, %v869_v9 }
 0x393   : > { %881 = vst.msk [vmem:[#allocation3 + $0x8] sm:$0xff] %vm580_vm1, %v878_v11 }
 0x396   : > { %v938_v12 = vld [vmem:[#allocation3] sm:$0xff] }
 0x397   : > { %1524 = vrcp.f32 %v938_v12 }
 0x39a   : > { %v939_v13 = vld [vmem:[#allocation3 + $0x8] sm:$0xff] }
 0x39b   : > { %1526 = vrcp.f32 %v939_v13 }
 0x3a4   : > { %v1525_v14 = vpop.eup %1524 }
 0x3a5   : > { %944 = vperm.xlu0 %1487, %v1525_v14  }
 0x3a8   : > { %v1527_v15 = vpop.eup %1526 }
 0x3a9   : > { %949 = vperm.xlu1 %1488, %v1527_v15  }
 0x3c8   : > { %v922_v16 = vpop.f32.mrf.mxu1 }
 0x3ca   : > { %v1330_v17 = vpop.f32.mrf.mxu1 }
 0x3cc   : > { %v925_v18 = vpop.f32.mrf.mxu1 }
 0x3ce   : > { %v1331_v19 = vpop.f32.mrf.mxu1 }
 0x420   : > { %v945_v20 = vpop.permute.xlu0 %944 }
 0x421   : > { %v952_v21 = vmul.f32 %v945_v20, %v922_v16 }
 0x423   : > { %954 = vst [vmem:[%s436_s19] sm:$0xff] %v952_v21 }
 0x424   : > { %v950_v22 = vpop.permute.xlu1 %949 }
 0x425   : > { %v953_v23 = vmul.f32 %v950_v22, %v925_v18 }
 0x427   : > { %955 = vst [vmem:[%s436_s19 + $0x8] sm:$0xff] %v953_v23 }
 0x428   : > { %1689 = shalt.err (!%p1686_p5)
}
 0x429   : > { %s1690_s6 = scalar_lea.hbm %s2256_s9, 256  ;;  %s1694_s11 = scalar_lea.hbm %s2416_s14, 1024 }
 0x42a   : > { %p1691_p2 = scmp.ne.s32.totalorder %s2256_s9, %s1690_s6  ;;  %p1695_p12 = scmp.lt.s32.totalorder %s2256_s9, %s2416_s14 }
 0x42b   : > { %p1696_p0 = scmp.lt.s32.totalorder %s1694_s11, %s1690_s6 }
 0x42c   : > { %p1692_p9 = pnand %p1691_p2, %p2004_p13 }
 0x42d   : > { %p1697_p6 = por %p1696_p0, %p1695_p12 }
 0x42e   : > { %p1693_p11 = pneg %p1692_p9 }
 0x430   : > { %p1698_p8 = pnand %p1697_p6, %p1693_p11 }
 0x432   : > { %1701 = shalt.err (!%p1698_p8)
}
 0x433   : > { %s1849_s27 = smov 128   ;;  %s1850_s23 = smov 8  }
 0x434   : > { %1342 = dma.vmem_to_hbm [thread:$0]  (%p2004_p13), %s2251_s24, 256, %s2256_s9, %s2258_s15, %s1849_s27, %s1849_s27, %s1850_s23  }
 0x435 PF: > { %s2417_s4 = sld [smem:[#allocation31_spill]] }
 0x436   : > { %s2418_s28 = sld [smem:[#allocation23_spill]] }
 0x437   : > { %s2419_s16 = sld [smem:[#allocation38_spill]] }
 0x43b   : > { %p1365_p10 = scmp.ge.s32.totalorder %s2417_s4, 2 }
 0x43c   : > { %s989_s19 = sand.u32 1, %s2418_s28  }
 0x43d   : > { %p2420_p3 = scmp.ne.s32.totalorder %s2419_s16, 0  ;;  %s990_s0 = scalar_lea.sflag [#allocation9], %s989_s19 }
 0x43f   : > { %p1361_p4 = pnand %p1365_p10, %p2420_p3 }
 0x441   : > { %p1362_p1 = pneg %p1361_p4 }
 0x443   : > { %1777 = dma.done.wait (%p1362_p1), %s990_s0, 256  }
 0x444   : > { %1779 = vsyncadd (%p1362_p1), %s990_s0, 4294967040  ;;  %s32_s12 = sadd.s32 1, %s2417_s4   ;;  %s2422_s24 = sld [smem:[#allocation24_spill]] }
 0x445   : > { %p2286_p7 = scmp.ge.s32.totalorder %s32_s12, 6   ;;  %s2423_s25 = sld [smem:[#allocation25_spill]] }
 0x446   : > { %s2424_s26 = sld [smem:[#allocation36_spill]]  ;;  %s2432_s29 = smov %s1810_s30 }
 0x447   : > { %s2425_s27 = sld [smem:[#allocation26_spill]]  ;;  %s2433_s30 = smov %s1814_s7 }
 0x448   : > { %s2426_s0 = sld [smem:[#allocation27_spill]]  ;;  %s2435_s8 = smov %s1826_s10 }
 0x449   : > { %s2427_s28 = sld [smem:[#allocation39_spill]] }
 0x44a   : > { %s2428_s2 = sld [smem:[#allocation35_spill]] }
 0x44b   : > { %s2429_s9 = sld [smem:[#allocation30_spill]] }
 0x44c   : > { %s2430_s15 = sld [smem:[#allocation33_spill]] }
 0x44d   : > { %s2431_s11 = sld [smem:[#allocation34_spill]] }
 0x44e   :  { %31 = sbr.rel (!%p2286_p7) target bundleno = 22 (0x16), region = 141 }
 0x450   : > { %s2434_s7 = smov %s2428_s2 }
 0x452   : > { %s2436_s10 = smov %s2430_s15 }
 0x453   :  { %995 = vsyncpa [#allocation8], 1 }
 0x454   :  { %997 = vsyncpa [#allocation8 + $0x1], 1 }
 0x455   :  { %998 = vsyncpa [#allocation11], 1 }
 0x456   :  { %1000 = vsyncpa [#allocation11 + $0x1], 1 }
 0x457   :  { %1001 = vsyncpa [#allocation14], 1 }
 0x458   :  { %1003 = vsyncpa [#allocation14 + $0x1], 1 }
 0x459   :  { %1004 = vsyncpa [#allocation9], 1 }
 0x45a   :  { %1006 = vsyncpa [#allocation9 + $0x1], 1 }

</bundles_post_ra>
